<compile_context>
chip_gen: v6e
topology: v6e:2x2x1
jax: 0.10.0
libtpu: 0.0.40
codegen_flags: <defaults>
</compile_context>

<pallas_src>
import functools

import jax
import jax.numpy as jnp
from jax.experimental import pallas as pl
from jax.experimental.pallas import tpu as pltpu


def _lm_criterion_kernel(x_ref, tgt_ref, msk_ref, out_ref, *, multi_vocab, upcast_tile):
    """One grid step: row block i of the flattened (N, V) input (and vocab tile j
    when `multi_vocab`).

    x_ref   : (ROW_TILE, V_TILE) f32/bf16 VMEM  log-prob tile
    tgt_ref : (ROW_TILE, 1)      i32      VMEM  gather indices (vocab ids)
    msk_ref : (ROW_TILE, 1)      f32      VMEM  per-token mask (0 on pad rows)
    out_ref : (ROW_TILE, 1)      f32      VMEM  per-row -logp*mask
    """
    x = x_ref[...]
    if upcast_tile:
        # v5e (no bf16 VPU): upcast the whole tile; no-op for f32 inputs.
        x = x.astype(jnp.float32)

    tgt = tgt_ref[...]                      # (R, 1) int32
    m = msk_ref[...]                        # (R, 1) f32

    if multi_vocab:
        # Fold the vocab-tile offset into the (R,1) scalar side of the compare
        # instead of adding it to the (R, Vt) iota.
        tgt = tgt - pl.program_id(1) * x_ref.shape[1]

    # One-hot gather of this vocab tile (exact even in bf16: <=1 nonzero/row).
    vocab_ids = jax.lax.broadcasted_iota(jnp.int32, x.shape, 1)
    hit = vocab_ids == tgt                                              # (R, Vt)
    picked = jnp.sum(jnp.where(hit, x, jnp.zeros_like(x)),
                     axis=1, keepdims=True).astype(jnp.float32)         # (R, 1)

    # Row-level select gate: kills NaNs from garbage rows of a ragged last
    # input block (m == 0 there) without a per-element mask op.
    contrib = jnp.where(m > 0.0, picked * (-m), 0.0)                    # (R, 1)

    if multi_vocab:
        @pl.when(pl.program_id(1) == 0)
        def _():
            out_ref[...] = jnp.zeros_like(out_ref)
        out_ref[...] += contrib
    else:
        out_ref[...] = contrib


@functools.lru_cache(maxsize=1)
def _chip_profile():
    """Returns (vmem_capacity_bytes, has_bf16_vpu) for the current TPU generation."""
    vmem = None
    try:
        vmem = int(pltpu.get_tpu_info().vmem_capacity_bytes)
    except Exception:
        vmem = None
    kind = ""
    try:
        kind = jax.devices()[0].device_kind.lower()
    except Exception:
        pass
    if vmem is None:
        vmem = (64 << 20) if "v7" in kind else (128 << 20)
    # v5e and older have no bf16 VPU; v6e/v7x do.
    has_bf16_vpu = not any(g in kind for g in ("v2", "v3", "v4", "v5"))
    return vmem, has_bf16_vpu


def _pick_tiles(n_rows, vocab, itemsize, vmem_bytes):
    """Pick (row_tile, vocab_tile, vmem_limit_bytes).

    Prefer full-V blocks (single contiguous DMA per step, no vocab reduction
    axis) and shrink row_tile first; split V only when even the minimum
    sublane-aligned row count would overflow the per-block budget, and then use
    the largest 128-multiple divisor of V that fits.
    """
    if vmem_bytes >= (96 << 20):               # v5e / v6e: 128 MiB VMEM
        block_budget, vmem_limit = 16 << 20, 80 << 20
    else:                                      # v7x: 64 MiB VMEM per TensorCore
        block_budget, vmem_limit = 10 << 20, 36 << 20

    row_align = 16 if itemsize == 2 else 8     # bf16 native sublane tile is 16 rows
    n_rows_pad = -(-n_rows // row_align) * row_align

    v_tile = vocab
    rows = block_budget // max(1, vocab * itemsize)
    if rows < row_align and vocab % 128 == 0:
        # Large-V fallback: largest 128-multiple divisor of V that fits the
        # budget with row_align rows.
        max_vt = max(128, block_budget // (row_align * itemsize))
        best, cand = 128, 128
        while cand <= vocab:
            if vocab % cand == 0 and cand <= max_vt:
                best = cand
            cand += 128
        v_tile = best
        rows = block_budget // max(1, v_tile * itemsize)

    rows = max(row_align, rows - rows % row_align)
    rows = min(rows, n_rows_pad)
    # Keep >= 2 row blocks when N allows it: the row axis is the only "parallel"
    # grid axis, so row_blocks == 1 would idle one of v7x's two TensorCores.
    half = ((n_rows + 1) // 2 + row_align - 1) // row_align * row_align
    rows = max(row_align, min(rows, half))

    # Safety for pathological full-V shapes (huge V not divisible by 128) that
    # exceed the block budget: grow the scoped-VMEM limit to cover 2 buffers.
    block_bytes = rows * v_tile * itemsize
    vmem_limit = max(vmem_limit,
                     min(vmem_bytes - (8 << 20), 2 * block_bytes + (4 << 20)))
    return rows, v_tile, vmem_limit


@jax.jit
def language_model_criterion(inp, target, mask):
    """loss = sum(-inp[b,t,target[b,t]] * mask[b,t]) / sum(mask), like the PyTorch module.

    Note: positions with mask == 0 contribute exactly 0 even if the gathered
    log-prob is non-finite (the reference would propagate NaN via -inf * 0).
    Out-of-range target ids contribute 0 (PyTorch gather would raise).
    """
    B, T, V = inp.shape
    target = target[:, :T].astype(jnp.int32)
    mask = mask[:, :T].astype(jnp.float32)
    if inp.dtype not in (jnp.float32, jnp.bfloat16):
        inp = inp.astype(jnp.float32)

    vmem_bytes, has_bf16_vpu = _chip_profile()
    N = B * T
    row_tile, v_tile, vmem_limit = _pick_tiles(N, V, inp.dtype.itemsize, vmem_bytes)
    assert V % v_tile == 0, (V, v_tile)
    v_blocks = V // v_tile
    row_blocks = pl.cdiv(N, row_tile)
    n_pad = row_blocks * row_tile
    multi_vocab = v_blocks > 1
    upcast_tile = (inp.dtype == jnp.bfloat16) and not has_bf16_vpu

    x = inp.reshape(N, V)          # metadata-only reshape; big tensor never copied
    t = target.reshape(N, 1)
    m = mask.reshape(N, 1)
    if n_pad != N:                 # pad only the tiny per-token arrays (8 bytes/row)
        t = jnp.pad(t, ((0, n_pad - N), (0, 0)))
        m = jnp.pad(m, ((0, n_pad - N), (0, 0)))

    kernel = functools.partial(_lm_criterion_kernel,
                               multi_vocab=multi_vocab, upcast_tile=upcast_tile)

    if multi_vocab:
        grid = (row_blocks, v_blocks)              # vocab (reduction) axis innermost
        in_specs = [
            pl.BlockSpec((row_tile, v_tile), lambda i, j: (i, j)),
            pl.BlockSpec((row_tile, 1), lambda i, j: (i, 0)),   # resident across j
            pl.BlockSpec((row_tile, 1), lambda i, j: (i, 0)),   # resident across j
        ]
        out_spec = pl.BlockSpec((row_tile, 1), lambda i, j: (i, 0))
        dim_sem = ("parallel", "arbitrary")
    else:
        grid = (row_blocks,)
        in_specs = [
            pl.BlockSpec((row_tile, v_tile), lambda i: (i, 0)),
            pl.BlockSpec((row_tile, 1), lambda i: (i, 0)),
            pl.BlockSpec((row_tile, 1), lambda i: (i, 0)),
        ]
        out_spec = pl.BlockSpec((row_tile, 1), lambda i: (i, 0))
        dim_sem = ("parallel",)

    per_row = pl.pallas_call(
        kernel,
        out_shape=jax.ShapeDtypeStruct((n_pad, 1), jnp.float32),
        grid_spec=pltpu.PrefetchScalarGridSpec(
            num_scalar_prefetch=0,
            grid=grid,
            in_specs=in_specs,
            out_specs=out_spec,
        ),
        compiler_params=pltpu.CompilerParams(
            dimension_semantics=dim_sem,
            vmem_limit_bytes=vmem_limit,
        ),
    )(x, t, m)

    # Tiny final reductions + divide in XLA (NaN if sum(mask) == 0, like the reference).
    return jnp.sum(per_row) / jnp.sum(mask)


def _reference(inp, target, mask):
    T = inp.shape[1]
    target = target[:, :T].astype(jnp.int32)
    mask = mask[:, :T].astype(jnp.float32)
    gathered = jnp.take_along_axis(inp.astype(jnp.float32), target[:, :, None], axis=2)[..., 0]
    out = -gathered * mask
    return jnp.sum(out) / jnp.sum(mask)


if __name__ == "__main__":
    B, T, V = 2, 8, 32
    T_long = T + 4  # target/mask deliberately longer to exercise the truncation

    key = jax.random.PRNGKey(0)
    k_inp, k_tgt, k_msk = jax.random.split(key, 3)

    # log-probs
    logits = jax.random.normal(k_inp, (B, T, V), dtype=jnp.float32)
    inp = jax.nn.log_softmax(logits, axis=-1)
    target = jax.random.randint(k_tgt, (B, T_long), 0, V, dtype=jnp.int32)
    # mask: ones for a random prefix length, never all-zero
    lens = jax.random.randint(k_msk, (B, 1), 1, T_long + 1)
    mask = (jnp.arange(T_long)[None, :] < lens).astype(jnp.float32)

    loss = language_model_criterion(inp, target, mask)
    jax.block_until_ready(loss)

    ref = _reference(inp, target, mask)
    assert jnp.allclose(loss, ref, rtol=1e-5, atol=1e-5), (loss, ref)
    print("KERNEL_OK")
</pallas_src>

<mosaic_0001>
module attributes {stable_mosaic.version = 11 : i64} {
  func.func @_lm_criterion_kernel(%arg0: i32, %arg1: memref<8x32xf32, #tpu.memory_space<vmem>>, %arg2: memref<8x1xi32, #tpu.memory_space<vmem>>, %arg3: memref<8x1xf32, #tpu.memory_space<vmem>>, %arg4: memref<8x1xf32, #tpu.memory_space<vmem>>) attributes {dimension_semantics = [#tpu.dimension_semantics<parallel>], iteration_bounds = array<i64: 2>, scalar_prefetch = 0 : i64, scratch_operands = 0 : i64, tpu.core_type = #tpu.core_type<tc>, window_params = [{transform_indices = @transform_0, window_bounds = array<i64: 8, 32>}, {transform_indices = @transform_1, window_bounds = array<i64: 8, 1>}, {transform_indices = @transform_2, window_bounds = array<i64: 8, 1>}, {transform_indices = @transform_3, window_bounds = array<i64: 8, 1>}]} {
    %c0 = arith.constant 0 : index
    %c0_0 = arith.constant 0 : index
    %0 = vector.load %arg1[%c0, %c0_0] : memref<8x32xf32, #tpu.memory_space<vmem>>, vector<8x32xf32>
    %c0_1 = arith.constant 0 : index
    %c0_2 = arith.constant 0 : index
    %1 = vector.load %arg2[%c0_1, %c0_2] : memref<8x1xi32, #tpu.memory_space<vmem>>, vector<8x1xi32>
    %c0_3 = arith.constant 0 : index
    %c0_4 = arith.constant 0 : index
    %2 = vector.load %arg3[%c0_3, %c0_4] : memref<8x1xf32, #tpu.memory_space<vmem>>, vector<8x1xf32>
    %3 = tpu.iota {dimensions = array<i32: 1>} : vector<8x32xi32>
    %4 = vector.broadcast %1 : vector<8x1xi32> to vector<8x32xi32>
    %5 = arith.cmpi eq, %3, %4 : vector<8x32xi32>
    %cst = arith.constant 0.000000e+00 : f32
    %6 = vector.broadcast %cst : f32 to vector<8x32xf32>
    %7 = arith.select %5, %0, %6 : vector<8x32xi1>, vector<8x32xf32>
    %cst_5 = arith.constant dense<0.000000e+00> : vector<8xf32>
    %8 = vector.multi_reduction <add>, %7, %cst_5 [1] : vector<8x32xf32> to vector<8xf32>
    %9 = vector.shape_cast %8 : vector<8xf32> to vector<8x1xf32>
    %cst_6 = arith.constant 0.000000e+00 : f32
    %10 = vector.broadcast %cst_6 : f32 to vector<8x1xf32>
    %11 = arith.cmpf ogt, %2, %10 : vector<8x1xf32>
    %cst_7 = arith.constant 0.000000e+00 : f32
    %12 = vector.broadcast %cst_7 : f32 to vector<8x1xf32>
    %13 = arith.subf %12, %2 : vector<8x1xf32>
    %14 = arith.mulf %9, %13 : vector<8x1xf32>
    %cst_8 = arith.constant 0.000000e+00 : f32
    %15 = vector.broadcast %cst_8 : f32 to vector<8x1xf32>
    %16 = arith.select %11, %14, %15 : vector<8x1xi1>, vector<8x1xf32>
    %c0_9 = arith.constant 0 : index
    %c0_10 = arith.constant 0 : index
    %17 = vector.load %arg4[%c0_9, %c0_10] : memref<8x1xf32, #tpu.memory_space<vmem>>, vector<8x1xf32>
    tpu.vector_store %arg4[%c0_9, %c0_10], %16 {strides = array<i32>} : memref<8x1xf32, #tpu.memory_space<vmem>>, vector<8x1xf32>,
    return
  }
  func.func @transform_0(%arg0: i32) -> (i32, i32) {
    %c0_i32 = arith.constant 0 : i32
    %c0_i32_0 = arith.constant 0 : i32
    return %arg0, %c0_i32 : i32, i32
  }
  func.func @transform_1(%arg0: i32) -> (i32, i32) {
    %c0_i32 = arith.constant 0 : i32
    %c0_i32_0 = arith.constant 0 : i32
    return %arg0, %c0_i32 : i32, i32
  }
  func.func @transform_2(%arg0: i32) -> (i32, i32) {
    %c0_i32 = arith.constant 0 : i32
    %c0_i32_0 = arith.constant 0 : i32
    return %arg0, %c0_i32 : i32, i32
  }
  func.func @transform_3(%arg0: i32) -> (i32, i32) {
    %c0_i32 = arith.constant 0 : i32
    %c0_i32_0 = arith.constant 0 : i32
    return %arg0, %c0_i32 : i32, i32
  }
}

</mosaic_0001>

<bundles_post_ra>
// kernel: language_model_criterion.1
= control target key start
LH: loop header
LB: loop body
LE: loop exit
PB: predicated region body
PF: predicated region fallthrough
CT: control target
= control target key end

     0   :  { %s347_s12 = smov 0   ;;  %s370_s0 = inlined_call_operand.vmem [shape: f32[16,32], index: 0, kind: input, shape index: {}]   ;;  %s371_s1 = inlined_call_operand.vmem [shape: s32[16,1], index: 1, kind: input, shape index: {}]   ;;  %s372_s2 = inlined_call_operand.vmem [shape: f32[16,1], index: 2, kind: input, shape index: {}]   ;;  %s373_s3 = inlined_call_operand.vmem [shape: f32[16,1], index: 3, kind: output, shape index: {}]  }
   0x1 LB: > { %s297_s13 = sadd.s32 4294967295, %s324_s12   ;;  %p301_p0 = scmp.ge.s32.totalorder %s324_s12, 1  ;;  %s324_s12 = sphi %s347_s12, %s13_s12  }
   0x2   : > { %p154_p1 = scmp.lt.s32.totalorder %s324_s12, 3 }
   0x4   : > { %p155_p2 = pnand %p301_p0, %p154_p1 }
   0x5   : > { %p184_p3 = scmp.lt.s32.totalorder (!%p155_p2), %s297_s13, 1 }
   0x6   : > { %158 = sbr.rel (%p155_p2) target bundleno = 284 (0x11c), region = 32 }
   0xb   : > { %v326_v0 = vmov 0   ;;  %s375_s13 = smov (!%p184_p3, %s297_s13), 1  ;;  %v203_v2 = vlaneseq  ;;  %vm210_vm0 = vcmask 261120   ;;  %vm218_vm3 = vcmask 7168  }
   0xc   : > { %317 = vset.pattern.permute.xlu0 %v326_v0  ;;  %s302_s14 = sshll.u32 %s375_s13, 3 }
   0xd   : > { %s191_s17 = scalar_lea.vmem %s371_s1, %s302_s14  ;;  %s187_s20 = scalar_lea.vmem %s370_s0, %s302_s14  ;;  %v204_v3 = vand.u32 127, %v203_v2 }
   0xe   : > { %v201_v1 = vld [vmem:[%s191_s17] sm:$0xff]  ;;  %s195_s23 = scalar_lea.vmem %s372_s2, %s302_s14  ;;  %s199_s26 = scalar_lea.vmem %s373_s3, %s302_s14 }
   0xf   : > { %206 = vperm.xlu0 %317, %v201_v1   ;;  %v200_v4 = vld [vmem:[%s187_s20] sm:$0xff] }
  0x10   : > { %v202_v8 = vld [vmem:[%s195_s23] sm:$0xff] }
  0x11   : > { %v215_v9 = vsub.f32 0.0, %v202_v8  ;;  %vm214_vm2 = vcmp.gt.f32.partialorder %v202_v8, 0.0 }
  0x8a   : > { %v207_v5 = vpop.permute.xlu0 %206 }
  0x8b   : > { %vm208_vm1 = vcmp.eq.s32.totalorder %v204_v3, %v207_v5 }
  0x8c   : > { %v209_v6 = vsel %vm208_vm1, %v200_v4, 0.0 }
  0x8d   : > { %v211_v7 = vsel %vm210_vm0, %v209_v6, 0.0 }
  0x8e   : > { %212 = vadd.xlane.f32.xlu0 %v211_v7 }
 0x117   : > { %v213_v10 = vpop.xlane.xlu0 %212 }
 0x118   : > { %v216_v11 = vmul.f32 %v215_v9, %v213_v10 }
 0x11a   : > { %v217_v12 = vsel %vm214_vm2, %v216_v11, 0.0 }
 0x11b   : > { %219 = vst.msk [vmem:[%s199_s26] sm:$0xff] %vm218_vm3, %v217_v12 }
 0x11c PF: > { %s13_s12 = sadd.s32 1, %s324_s12  }
 0x11d   : > { %p10_p4 = scmp.ge.s32.totalorder %s13_s12, 4  }
 0x11f   :  { %12 = sbr.rel (!%p10_p4) target bundleno = 1 (0x1), region = 68 }

</bundles_post_ra>
